<compile_context>
chip_gen: v6e
topology: v6e:2x2x1
jax: 0.10.0
libtpu: 0.0.40
codegen_flags: <defaults>
</compile_context>

<pallas_src>
import math
import numpy as np
import jax
import jax.numpy as jnp
from jax.experimental import pallas as pl
from jax.experimental.pallas import tpu as pltpu

NEG_SLOPE = 0.01  # torch.nn.LeakyReLU default negative_slope


def _leaky_relu(x):
    return jnp.where(x > 0, x, NEG_SLOPE * x)


def _round_up(n, m):
    return ((n + m - 1) // m) * m


def sena_ae_kernel(x_ref, w1t_ref, b1_ref, w2t_ref, b2_ref, w3t_ref, b3_ref, o_ref):
    """Fused SENA autoencoder forward for one batch tile.

    x_ref   : (TB, Dp)        input tile (padded feature dim)
    w1t_ref : (Dp, Lp)        (first_layer.weight * mask.T).T, padded  (mask folded offline)
    b1_ref  : (1, Lp)         f32
    w2t_ref : (Lp, Lp)        encoder_hidden.weight.T, padded
    b2_ref  : (1, Lp)         f32
    w3t_ref : (Lp, Dp)        decoder.weight.T, padded
    b3_ref  : (1, Dp)         f32
    o_ref   : (TB, Dp)
    """
    x = x_ref[...]

    # NetworkActivityLayer: x @ (W1 * mask.T).T + b1  (mask already folded into w1t)
    h = jnp.dot(x, w1t_ref[...], preferred_element_type=jnp.float32)       # (TB, Lp) MXU
    h = _leaky_relu(h + b1_ref[...])                                       # f32 VPU

    # encoder_hidden: Linear(L, L)
    h2 = jnp.dot(h.astype(w2t_ref.dtype), w2t_ref[...],
                 preferred_element_type=jnp.float32)                       # (TB, Lp)
    h2 = _leaky_relu(h2 + b2_ref[...])

    # decoder: Linear(L, D_in)
    out = jnp.dot(h2.astype(w3t_ref.dtype), w3t_ref[...],
                  preferred_element_type=jnp.float32)                      # (TB, Dp)
    out = out + b3_ref[...]

    o_ref[...] = out.astype(o_ref.dtype)


def make_params(key, input_size, latent_size, relation_dict, lambda_sena=0.0,
                dtype=jnp.float32):
    """Deterministic parameter init matching the PyTorch module's shapes."""
    k1, k2, k3, k4, k5, k6 = jax.random.split(key, 6)

    # SENA mask: (input_size, latent_size), 1 where related, lambda elsewhere.
    mask = np.full((input_size, latent_size), lambda_sena, dtype=np.float32)
    for i in range(input_size):
        for j in relation_dict.get(i, []):
            mask[i, j] = 1.0
    mask = jnp.asarray(mask, dtype)

    def kaiming_uniform(k, shape):
        fan_in = shape[1]
        bound = 1.0 / math.sqrt(fan_in)  # kaiming_uniform_ with a=sqrt(5)
        return jax.random.uniform(k, shape, dtype, -bound, bound)

    def bias_uniform(k, fan_in, n):
        bound = 1.0 / math.sqrt(fan_in)
        return jax.random.uniform(k, (1, n), dtype, -bound, bound)

    return {
        "mask": mask,                                             # (D, L)
        "w1": kaiming_uniform(k1, (latent_size, input_size)),     # first_layer.weight
        "b1": bias_uniform(k2, input_size, latent_size),
        "w2": kaiming_uniform(k3, (latent_size, latent_size)),    # encoder_hidden.weight
        "b2": bias_uniform(k4, latent_size, latent_size),
        "w3": kaiming_uniform(k5, (input_size, latent_size)),     # decoder.weight
        "b3": bias_uniform(k6, latent_size, input_size),
    }


def pack_params(params, *, compute_dtype=jnp.float32):
    """One-time host-side prep: fold mask into w1, transpose all weights, and
    zero-pad feature/latent dims to multiples of 128 (lane-dense)."""
    L, D = params["w1"].shape
    Dp = _round_up(D, 128)
    Lp = _round_up(L, 128)

    def pad2(a, r, c):
        return jnp.pad(a, ((0, r - a.shape[0]), (0, c - a.shape[1])))

    w1t = (params["w1"] * params["mask"].T).T     # (D, L) effective weight, transposed
    w2t = params["w2"].T                          # (L, L)
    w3t = params["w3"].T                          # (L, D)

    packed = {
        "w1t": pad2(w1t, Dp, Lp).astype(compute_dtype),
        "b1":  pad2(params["b1"], 1, Lp).astype(jnp.float32),
        "w2t": pad2(w2t, Lp, Lp).astype(compute_dtype),
        "b2":  pad2(params["b2"], 1, Lp).astype(jnp.float32),
        "w3t": pad2(w3t, Lp, Dp).astype(compute_dtype),
        "b3":  pad2(params["b3"], 1, Dp).astype(jnp.float32),
    }
    return packed, (D, L, Dp, Lp)


def sena_forward(x, packed, dims, *, tile_b=128, compute_dtype=jnp.float32):
    D, L, Dp, Lp = dims
    B = x.shape[0]

    # Batch tile: full batch (single grid step) when small, else 128-row tiles on a
    # "parallel" grid axis (megacore-shardable on v7x).
    tile_b = min(tile_b, _round_up(B, 8))
    B_pad = _round_up(B, tile_b)
    x_p = jnp.pad(x, ((0, B_pad - B), (0, Dp - D))).astype(compute_dtype)

    grid = (B_pad // tile_b,)
    full = lambda i: (0, 0)  # weights/biases are resident (full-array blocks)

    # TODO(synk): for very large D_in (thousands of genes), w1t/w3t should be
    # K-blocked over an extra "arbitrary" grid axis with an f32 accumulator to
    # stay inside v7x's 64 MiB VMEM instead of kept fully resident.
    out = pl.pallas_call(
        sena_ae_kernel,
        out_shape=jax.ShapeDtypeStruct((B_pad, Dp), jnp.float32),
        grid=grid,
        in_specs=[
            pl.BlockSpec((tile_b, Dp), lambda i: (i, 0)),   # x
            pl.BlockSpec((Dp, Lp), full),                   # w1t (mask folded)
            pl.BlockSpec((1, Lp), full),                    # b1
            pl.BlockSpec((Lp, Lp), full),                   # w2t
            pl.BlockSpec((1, Lp), full),                    # b2
            pl.BlockSpec((Lp, Dp), full),                   # w3t
            pl.BlockSpec((1, Dp), full),                    # b3
        ],
        out_specs=pl.BlockSpec((tile_b, Dp), lambda i: (i, 0)),
        compiler_params=pltpu.CompilerParams(
            dimension_semantics=("parallel",)),
    )(x_p, packed["w1t"], packed["b1"], packed["w2t"], packed["b2"],
      packed["w3t"], packed["b3"])

    return out[:B, :D]


def sena_forward_ref(x, params):
    """Pure-JAX reference for the same forward pass (PyTorch-shaped params)."""
    eff_w1 = params["w1"] * params["mask"].T
    h = _leaky_relu(x @ eff_w1.T + params["b1"])
    h = _leaky_relu(h @ params["w2"].T + params["b2"])
    return h @ params["w3"].T + params["b3"]


if __name__ == "__main__":
    INPUT_SIZE = 64
    LATENT_SIZE = 32
    BATCH = 16

    # Deterministic synthetic relation_dict: gene i connects to 2 latent pathways.
    relation_dict = {i: [i % LATENT_SIZE, (i * 3 + 1) % LATENT_SIZE]
                     for i in range(INPUT_SIZE)}

    key = jax.random.PRNGKey(0)
    kx, kp = jax.random.split(key)
    x = jax.random.normal(kx, (BATCH, INPUT_SIZE), jnp.float32)
    params = make_params(kp, INPUT_SIZE, LATENT_SIZE, relation_dict, lambda_sena=0.0)

    # compute_dtype=jnp.bfloat16 halves weight DMA / doubles MXU throughput on
    # v6e/v7x (bias + LeakyReLU stay f32); f32 here so the check is exact.
    packed, dims = pack_params(params, compute_dtype=jnp.float32)
    out = sena_forward(x, packed, dims, tile_b=128)
    out = jax.block_until_ready(out)

    ref = sena_forward_ref(x, params)
    np.testing.assert_allclose(np.asarray(out), np.asarray(ref), rtol=1e-5, atol=1e-5)

    # TODO(synk): 'vae' mode (softplus + reparameterize with prng_random_bits) not
    # exercised here; this script implements the 'ae', nlayers=2 path.
    print("KERNEL_OK")
</pallas_src>

<mosaic_0001>
module attributes {stable_mosaic.version = 11 : i64} {
  func.func @sena_ae_kernel(%arg0: i32, %arg1: memref<16x128xf32, #tpu.memory_space<vmem>>, %arg2: memref<128x128xf32, #tpu.memory_space<vmem>>, %arg3: memref<1x128xf32, #tpu.memory_space<vmem>>, %arg4: memref<128x128xf32, #tpu.memory_space<vmem>>, %arg5: memref<1x128xf32, #tpu.memory_space<vmem>>, %arg6: memref<128x128xf32, #tpu.memory_space<vmem>>, %arg7: memref<1x128xf32, #tpu.memory_space<vmem>>, %arg8: memref<16x128xf32, #tpu.memory_space<vmem>>) attributes {dimension_semantics = [#tpu.dimension_semantics<parallel>], iteration_bounds = array<i64: 1>, scalar_prefetch = 0 : i64, scratch_operands = 0 : i64, tpu.core_type = #tpu.core_type<tc>, window_params = [{transform_indices = @transform_0, window_bounds = array<i64: 16, 128>}, {pipeline_mode = #tpu.pipeline_mode<synchronous>, transform_indices = @transform_1, window_bounds = array<i64: 128, 128>}, {pipeline_mode = #tpu.pipeline_mode<synchronous>, transform_indices = @transform_2, window_bounds = array<i64: 1, 128>}, {pipeline_mode = #tpu.pipeline_mode<synchronous>, transform_indices = @transform_3, window_bounds = array<i64: 128, 128>}, {pipeline_mode = #tpu.pipeline_mode<synchronous>, transform_indices = @transform_4, window_bounds = array<i64: 1, 128>}, {pipeline_mode = #tpu.pipeline_mode<synchronous>, transform_indices = @transform_5, window_bounds = array<i64: 128, 128>}, {pipeline_mode = #tpu.pipeline_mode<synchronous>, transform_indices = @transform_6, window_bounds = array<i64: 1, 128>}, {transform_indices = @transform_7, window_bounds = array<i64: 16, 128>}]} {
    %c0 = arith.constant 0 : index
    %c0_0 = arith.constant 0 : index
    %0 = vector.load %arg1[%c0, %c0_0] : memref<16x128xf32, #tpu.memory_space<vmem>>, vector<16x128xf32>
    %c0_1 = arith.constant 0 : index
    %c0_2 = arith.constant 0 : index
    %1 = vector.load %arg2[%c0_1, %c0_2] : memref<128x128xf32, #tpu.memory_space<vmem>>, vector<128x128xf32>
    %cst = arith.constant dense<0.000000e+00> : vector<16x128xf32>
    %2 = tpu.matmul %0, %1, %cst {dimension_numbers = #tpu.dot_dimension_numbers<[1], [0], [0], [1], [0, 0, 1, 1], [], []>} : vector<16x128xf32>, vector<128x128xf32>, vector<16x128xf32> -> vector<16x128xf32>
    %c0_3 = arith.constant 0 : index
    %c0_4 = arith.constant 0 : index
    %3 = vector.load %arg3[%c0_3, %c0_4] : memref<1x128xf32, #tpu.memory_space<vmem>>, vector<1x128xf32>
    %4 = vector.broadcast %3 : vector<1x128xf32> to vector<16x128xf32>
    %5 = arith.addf %2, %4 : vector<16x128xf32>
    %cst_5 = arith.constant 0.000000e+00 : f32
    %6 = vector.broadcast %cst_5 : f32 to vector<16x128xf32>
    %7 = arith.cmpf ogt, %5, %6 : vector<16x128xf32>
    %cst_6 = arith.constant 0.00999999977 : f32
    %8 = vector.broadcast %cst_6 : f32 to vector<16x128xf32>
    %9 = arith.mulf %8, %5 : vector<16x128xf32>
    %10 = arith.select %7, %5, %9 : vector<16x128xi1>, vector<16x128xf32>
    %c0_7 = arith.constant 0 : index
    %c0_8 = arith.constant 0 : index
    %11 = vector.load %arg4[%c0_7, %c0_8] : memref<128x128xf32, #tpu.memory_space<vmem>>, vector<128x128xf32>
    %cst_9 = arith.constant dense<0.000000e+00> : vector<16x128xf32>
    %12 = tpu.matmul %10, %11, %cst_9 {dimension_numbers = #tpu.dot_dimension_numbers<[1], [0], [0], [1], [0, 0, 1, 1], [], []>} : vector<16x128xf32>, vector<128x128xf32>, vector<16x128xf32> -> vector<16x128xf32>
    %c0_10 = arith.constant 0 : index
    %c0_11 = arith.constant 0 : index
    %13 = vector.load %arg5[%c0_10, %c0_11] : memref<1x128xf32, #tpu.memory_space<vmem>>, vector<1x128xf32>
    %14 = vector.broadcast %13 : vector<1x128xf32> to vector<16x128xf32>
    %15 = arith.addf %12, %14 : vector<16x128xf32>
    %cst_12 = arith.constant 0.000000e+00 : f32
    %16 = vector.broadcast %cst_12 : f32 to vector<16x128xf32>
    %17 = arith.cmpf ogt, %15, %16 : vector<16x128xf32>
    %cst_13 = arith.constant 0.00999999977 : f32
    %18 = vector.broadcast %cst_13 : f32 to vector<16x128xf32>
    %19 = arith.mulf %18, %15 : vector<16x128xf32>
    %20 = arith.select %17, %15, %19 : vector<16x128xi1>, vector<16x128xf32>
    %c0_14 = arith.constant 0 : index
    %c0_15 = arith.constant 0 : index
    %21 = vector.load %arg6[%c0_14, %c0_15] : memref<128x128xf32, #tpu.memory_space<vmem>>, vector<128x128xf32>
    %cst_16 = arith.constant dense<0.000000e+00> : vector<16x128xf32>
    %22 = tpu.matmul %20, %21, %cst_16 {dimension_numbers = #tpu.dot_dimension_numbers<[1], [0], [0], [1], [0, 0, 1, 1], [], []>} : vector<16x128xf32>, vector<128x128xf32>, vector<16x128xf32> -> vector<16x128xf32>
    %c0_17 = arith.constant 0 : index
    %c0_18 = arith.constant 0 : index
    %23 = vector.load %arg7[%c0_17, %c0_18] : memref<1x128xf32, #tpu.memory_space<vmem>>, vector<1x128xf32>
    %24 = vector.broadcast %23 : vector<1x128xf32> to vector<16x128xf32>
    %25 = arith.addf %22, %24 : vector<16x128xf32>
    %c0_19 = arith.constant 0 : index
    %c0_20 = arith.constant 0 : index
    %26 = vector.load %arg8[%c0_19, %c0_20] : memref<16x128xf32, #tpu.memory_space<vmem>>, vector<16x128xf32>
    tpu.vector_store %arg8[%c0_19, %c0_20], %25 {strides = array<i32>} : memref<16x128xf32, #tpu.memory_space<vmem>>, vector<16x128xf32>,
    return
  }
  func.func @transform_0(%arg0: i32) -> (i32, i32) {
    %c0_i32 = arith.constant 0 : i32
    %c0_i32_0 = arith.constant 0 : i32
    return %arg0, %c0_i32 : i32, i32
  }
  func.func @transform_1(%arg0: i32) -> (i32, i32) {
    %c0_i32 = arith.constant 0 : i32
    %c0_i32_0 = arith.constant 0 : i32
    %c0_i32_1 = arith.constant 0 : i32
    return %c0_i32, %c0_i32_0 : i32, i32
  }
  func.func @transform_2(%arg0: i32) -> (i32, i32) {
    %c0_i32 = arith.constant 0 : i32
    %c0_i32_0 = arith.constant 0 : i32
    %c0_i32_1 = arith.constant 0 : i32
    return %c0_i32, %c0_i32_0 : i32, i32
  }
  func.func @transform_3(%arg0: i32) -> (i32, i32) {
    %c0_i32 = arith.constant 0 : i32
    %c0_i32_0 = arith.constant 0 : i32
    %c0_i32_1 = arith.constant 0 : i32
    return %c0_i32, %c0_i32_0 : i32, i32
  }
  func.func @transform_4(%arg0: i32) -> (i32, i32) {
    %c0_i32 = arith.constant 0 : i32
    %c0_i32_0 = arith.constant 0 : i32
    %c0_i32_1 = arith.constant 0 : i32
    return %c0_i32, %c0_i32_0 : i32, i32
  }
  func.func @transform_5(%arg0: i32) -> (i32, i32) {
    %c0_i32 = arith.constant 0 : i32
    %c0_i32_0 = arith.constant 0 : i32
    %c0_i32_1 = arith.constant 0 : i32
    return %c0_i32, %c0_i32_0 : i32, i32
  }
  func.func @transform_6(%arg0: i32) -> (i32, i32) {
    %c0_i32 = arith.constant 0 : i32
    %c0_i32_0 = arith.constant 0 : i32
    %c0_i32_1 = arith.constant 0 : i32
    return %c0_i32, %c0_i32_0 : i32, i32
  }
  func.func @transform_7(%arg0: i32) -> (i32, i32) {
    %c0_i32 = arith.constant 0 : i32
    %c0_i32_0 = arith.constant 0 : i32
    return %arg0, %c0_i32 : i32, i32
  }
}

</mosaic_0001>

<bundles_post_ra>
// kernel: tpu_custom_call.1
= control target key start
LH: loop header
LB: loop body
LE: loop exit
PB: predicated region body
PF: predicated region fallthrough
CT: control target
= control target key end

     0   :  { %12 = vsyncpa [#allocation3], 0  ;;  %s774_s0 = inlined_call_operand.hbm [shape: f32[16,128], index: 0, kind: input, shape index: {}]   ;;  %s775_s1 = inlined_call_operand.hbm [shape: f32[128,128], index: 1, kind: input, shape index: {}]   ;;  %s776_s2 = inlined_call_operand.vmem [shape: f32[1,128], index: 2, kind: input, shape index: {}]   ;;  %s777_s3 = inlined_call_operand.hbm [shape: f32[128,128], index: 3, kind: input, shape index: {}]   ;;  %s778_s4 = inlined_call_operand.vmem [shape: f32[1,128], index: 4, kind: input, shape index: {}]   ;;  %s779_s5 = inlined_call_operand.hbm [shape: f32[128,128], index: 5, kind: input, shape index: {}]   ;;  %s780_s6 = inlined_call_operand.vmem [shape: f32[1,128], index: 6, kind: input, shape index: {}]   ;;  %s781_s7 = inlined_call_operand.hbm [shape: f32[16,128], index: 7, kind: output, shape index: {}]  }
   0x1   :  { %13 = vsyncpa [#allocation6], 0 }
   0x2   :  { %14 = vsyncpa [#allocation9], 0 }
   0x3   :  { %15 = vsyncpa [#allocation4], 0  ;;  %s688_s24 = smov [#allocation5]   ;;  %s689_s26 = smov [#allocation2]  }
   0x4   :  { %s33_s25 = sshll.u32 %s688_s24, 4  ;;  %s21_s27 = sshll.u32 %s689_s26, 4  ;;  %s34_s25 = int_to_ptr.vmem [resolvable:$true] %s33_s25  ;;  %s22_s27 = int_to_ptr.vmem [resolvable:$true] %s21_s27 }
   0x5   :  { %s588_s28 = scalar_lea.vmem %s34_s25, 2048  ;;  %p593_p1 = scmp.lt.s32.totalorder %s34_s25, %s34_s25 }
   0x6   :  { %p589_p0 = scmp.ne.s32.totalorder %s34_s25, %s588_s28  ;;  %p594_p2 = scmp.lt.s32.totalorder %s588_s28, %s588_s28 }
   0x8   :  { %p595_p3 = por %p594_p2, %p593_p1 }
   0xa   :  { %p596_p4 = pnand %p595_p3, %p589_p0 }
   0xc   :  { %599 = shalt.err (!%p596_p4)
}
   0xd   :  { %s690_s29 = smov 128   ;;  %s691_s30 = smov 8  }
   0xe   :  { %39 = dma.hbm_to_vmem [thread:$0]  %s775_s1, 2048, %s34_s25, [#allocation6], %s690_s29, %s690_s29, %s691_s30  }
   0xf   :  { %s608_s10 = scalar_lea.vmem %s22_s27, 256  ;;  %p613_p6 = scmp.lt.s32.totalorder %s22_s27, %s22_s27 }
  0x10   :  { %p609_p5 = scmp.ne.s32.totalorder %s22_s27, %s608_s10  ;;  %p614_p7 = scmp.lt.s32.totalorder %s608_s10, %s608_s10 }
  0x12   :  { %p615_p8 = por %p614_p7, %p613_p6 }
  0x14   :  { %p616_p9 = pnand %p615_p8, %p609_p5 }
  0x16   :  { %619 = shalt.err (!%p616_p9)
}
  0x17   :  { %27 = dma.hbm_to_vmem [thread:$0]  %s774_s0, 256, %s22_s27, [#allocation3], %s690_s29, %s690_s29, %s691_s30  }
  0x18   :  { %s692_s13 = smov [#allocation7]   ;;  %s693_s15 = smov [#allocation8]  }
  0x19   :  { %s47_s14 = sshll.u32 %s692_s13, 4  ;;  %s61_s16 = sshll.u32 %s693_s15, 4  ;;  %s48_s14 = int_to_ptr.vmem [resolvable:$true] %s47_s14  ;;  %s62_s16 = int_to_ptr.vmem [resolvable:$true] %s61_s16 }
  0x1a   :  { %s628_s1 = scalar_lea.vmem %s48_s14, 2048  ;;  %p633_p11 = scmp.lt.s32.totalorder %s48_s14, %s48_s14 }
  0x1b   :  { %p629_p10 = scmp.ne.s32.totalorder %s48_s14, %s628_s1  ;;  %p634_p12 = scmp.lt.s32.totalorder %s628_s1, %s628_s1 }
  0x1d   :  { %p635_p13 = por %p634_p12, %p633_p11 }
  0x1f   :  { %p636_p0 = pnand %p635_p13, %p629_p10 }
  0x21   :  { %639 = shalt.err (!%p636_p0)
}
  0x22   :  { %53 = dma.hbm_to_vmem [thread:$0]  %s777_s3, 2048, %s48_s14, [#allocation6], %s690_s29, %s690_s29, %s691_s30  }
  0x23   :  { %s648_s0 = scalar_lea.vmem %s62_s16, 2048  ;;  %p653_p2 = scmp.lt.s32.totalorder %s62_s16, %s62_s16 }
  0x24   :  { %p649_p1 = scmp.ne.s32.totalorder %s62_s16, %s648_s0  ;;  %p654_p3 = scmp.lt.s32.totalorder %s648_s0, %s648_s0 }
  0x26   :  { %p655_p4 = por %p654_p3, %p653_p2 }
  0x28   :  { %p656_p5 = pnand %p655_p4, %p649_p1 }
  0x2a   :  { %659 = shalt.err (!%p656_p5)
}
  0x2b   :  { %67 = dma.hbm_to_vmem [thread:$0]  %s779_s5, 2048, %s62_s16, [#allocation9], %s690_s29, %s690_s29, %s691_s30  }
  0x2c   :  { %680 = dma.done.wait [#allocation3], 256  }
  0x2d   :  { %681 = vsyncadd [#allocation3], 4294967040 }
  0x2e   :  { %682 = dma.done.wait [#allocation6], 4096  }
  0x2f   :  { %683 = vsyncadd [#allocation6], 4294963200 }
  0x30   :  { %684 = dma.done.wait [#allocation9], 2048  }
  0x31   :  { %685 = vsyncadd [#allocation9], 4294965248  ;;  %v99_v0 = vld [vmem:[#allocation5 + $0x78] sm:$0xff]  ;;  %v98_v1 = vld [vmem:[#allocation5 + $0x70] sm:$0xff]  ;;  %s694_s24 = smov [#allocation10]  }
  0x32   :  { %468 = vmatprep.subr.mxu0 %v99_v0  ;;  %v97_v2 = vld [vmem:[#allocation5 + $0x68] sm:$0xff]  ;;  %v96_v3 = vld [vmem:[#allocation5 + $0x60] sm:$0xff]  ;;  %v82_v4 = vld [vmem:[#allocation2] sm:$0xff]  ;;  %s397_s25 = sshll.u32 %s694_s24, 4  ;;  %s398_s25 = int_to_ptr.vmem [resolvable:$true] %s397_s25 }
  0x33   :  { %469 = vmatpush3.msra.mxu0 %v99_v0  ;;  %v95_v5 = vld [vmem:[#allocation5 + $0x58] sm:$0xff]  ;;  %500 = vmatprep.mubr.f32.mxu0 %v82_v4  ;;  %v202_v7 = vld [vmem:[#allocation7 + $0x70] sm:$0xff]  ;;  %v201_v9 = vld [vmem:[#allocation7 + $0x68] sm:$0xff]  ;;  %p665_p7 = scmp.lt.s32.totalorder %s398_s25, %s398_s25 }
  0x34   :  { %470 = vmatprep.subr.mxu0 %v98_v1  ;;  %v203_v6 = vld [vmem:[#allocation7 + $0x78] sm:$0xff]  ;;  %v94_v8 = vld [vmem:[#allocation5 + $0x50] sm:$0xff]  ;;  %v93_v10 = vld [vmem:[#allocation5 + $0x48] sm:$0xff] }
  0x35   :  { %471 = vmatpush3.msra.mxu0 %v98_v1  ;;  %503 = vmatprep.subr.mxu1 %v203_v6  ;;  %v200_v11 = vld [vmem:[#allocation7 + $0x60] sm:$0xff]  ;;  %v199_v13 = vld [vmem:[#allocation7 + $0x58] sm:$0xff]  ;;  %v198_v15 = vld [vmem:[#allocation7 + $0x50] sm:$0xff] }
  0x36   :  { %472 = vmatprep.subr.mxu0 %v97_v2  ;;  %504 = vmatpush3.msra.mxu1 %v203_v6  ;;  %v92_v12 = vld [vmem:[#allocation5 + $0x40] sm:$0xff]  ;;  %v91_v14 = vld [vmem:[#allocation5 + $0x38] sm:$0xff]  ;;  %v90_v16 = vld [vmem:[#allocation5 + $0x30] sm:$0xff] }
  0x37   :  { %473 = vmatpush3.msra.mxu0 %v97_v2  ;;  %505 = vmatprep.subr.mxu1 %v202_v7  ;;  %v197_v17 = vld [vmem:[#allocation7 + $0x48] sm:$0xff]  ;;  %v196_v19 = vld [vmem:[#allocation7 + $0x40] sm:$0xff]  ;;  %v195_v21 = vld [vmem:[#allocation7 + $0x38] sm:$0xff] }
  0x38   :  { %474 = vmatprep.subr.mxu0 %v96_v3  ;;  %506 = vmatpush3.msra.mxu1 %v202_v7  ;;  %v89_v18 = vld [vmem:[#allocation5 + $0x28] sm:$0xff]  ;;  %v88_v20 = vld [vmem:[#allocation5 + $0x20] sm:$0xff]  ;;  %v87_v22 = vld [vmem:[#allocation5 + $0x18] sm:$0xff] }
  0x39   :  { %475 = vmatpush3.msra.mxu0 %v96_v3  ;;  %507 = vmatprep.subr.mxu1 %v201_v9  ;;  %v194_v23 = vld [vmem:[#allocation7 + $0x30] sm:$0xff]  ;;  %v193_v25 = vld [vmem:[#allocation7 + $0x28] sm:$0xff]  ;;  %v192_v27 = vld [vmem:[#allocation7 + $0x20] sm:$0xff] }
  0x3a   :  { %476 = vmatprep.subr.mxu0 %v95_v5  ;;  %508 = vmatpush3.msra.mxu1 %v201_v9  ;;  %v86_v24 = vld [vmem:[#allocation5 + $0x10] sm:$0xff]  ;;  %v85_v26 = vld [vmem:[#allocation5 + $0x8] sm:$0xff]  ;;  %v84_v28 = vld [vmem:[#allocation5] sm:$0xff] }
  0x3b   :  { %477 = vmatpush3.msra.mxu0 %v95_v5  ;;  %509 = vmatprep.subr.mxu1 %v200_v11  ;;  %v83_v29 = vld [vmem:[#allocation2 + $0x8] sm:$0xff]  ;;  %v190_v31 = vld [vmem:[#allocation7 + $0x10] sm:$0xff]  ;;  %v189_v32 = vld [vmem:[#allocation7 + $0x8] sm:$0xff] }
  0x3c   :  { %478 = vmatprep.subr.mxu0 %v94_v8  ;;  %510 = vmatpush3.msra.mxu1 %v200_v11  ;;  %v191_v30 = vld [vmem:[#allocation7 + $0x18] sm:$0xff]  ;;  %v188_v33 = vld [vmem:[#allocation7] sm:$0xff]  ;;  %v306_v35 = vld [vmem:[#allocation8 + $0x70] sm:$0xff] }
  0x3d   :  { %479 = vmatpush3.msra.mxu0 %v94_v8  ;;  %511 = vmatprep.subr.mxu1 %v199_v13  ;;  %v307_v34 = vld [vmem:[#allocation8 + $0x78] sm:$0xff]  ;;  %v305_v36 = vld [vmem:[#allocation8 + $0x68] sm:$0xff]  ;;  %v304_v37 = vld [vmem:[#allocation8 + $0x60] sm:$0xff] }
  0x3e   :  { %480 = vmatprep.subr.mxu0 %v93_v10  ;;  %512 = vmatpush3.msra.mxu1 %v199_v13  ;;  %v303_v38 = vld [vmem:[#allocation8 + $0x58] sm:$0xff]  ;;  %v302_v39 = vld [vmem:[#allocation8 + $0x50] sm:$0xff]  ;;  %v301_v40 = vld [vmem:[#allocation8 + $0x48] sm:$0xff] }
  0x3f   :  { %481 = vmatpush3.msra.mxu0 %v93_v10  ;;  %513 = vmatprep.subr.mxu1 %v198_v15  ;;  %v300_v41 = vld [vmem:[#allocation8 + $0x40] sm:$0xff]  ;;  %v299_v42 = vld [vmem:[#allocation8 + $0x38] sm:$0xff]  ;;  %v298_v43 = vld [vmem:[#allocation8 + $0x30] sm:$0xff] }
  0x40   :  { %482 = vmatprep.subr.mxu0 %v92_v12  ;;  %514 = vmatpush3.msra.mxu1 %v198_v15  ;;  %v297_v44 = vld [vmem:[#allocation8 + $0x28] sm:$0xff]  ;;  %v296_v45 = vld [vmem:[#allocation8 + $0x20] sm:$0xff]  ;;  %v411_v46 = vld [vmem:[%s776_s2] ss:$0 sm:$0xff] }
  0x41   :  { %483 = vmatpush3.msra.mxu0 %v92_v12  ;;  %515 = vmatprep.subr.mxu1 %v197_v17  ;;  %v295_v55 = vld [vmem:[#allocation8 + $0x18] sm:$0xff]  ;;  %v294_v56 = vld [vmem:[#allocation8 + $0x10] sm:$0xff]  ;;  %v293_v57 = vld [vmem:[#allocation8 + $0x8] sm:$0xff] }
  0x42   :  { %484 = vmatprep.subr.mxu0 %v91_v14  ;;  %516 = vmatpush3.msra.mxu1 %v197_v17  ;;  %v292_v58 = vld [vmem:[#allocation8] sm:$0xff]  ;;  %v412_v59 = vld [vmem:[%s778_s4] ss:$0 sm:$0xff]  ;;  %s660_s4 = scalar_lea.vmem %s398_s25, 256 }
  0x43   :  { %485 = vmatpush3.msra.mxu0 %v91_v14  ;;  %517 = vmatprep.subr.mxu1 %v196_v19  ;;  %v413_v4 = vld [vmem:[%s780_s6] ss:$0 sm:$0xff]  ;;  %p661_p6 = scmp.ne.s32.totalorder %s398_s25, %s660_s4  ;;  %p666_p8 = scmp.lt.s32.totalorder %s660_s4, %s660_s4 }
  0x44   :  { %486 = vmatprep.subr.mxu0 %v90_v16  ;;  %518 = vmatpush3.msra.mxu1 %v196_v19 }
  0x45   :  { %487 = vmatpush3.msra.mxu0 %v90_v16  ;;  %519 = vmatprep.subr.mxu1 %v195_v21  ;;  %p667_p9 = por %p666_p8, %p665_p7 }
  0x46   :  { %488 = vmatprep.subr.mxu0 %v89_v18  ;;  %520 = vmatpush3.msra.mxu1 %v195_v21 }
  0x47   :  { %489 = vmatpush3.msra.mxu0 %v89_v18  ;;  %521 = vmatprep.subr.mxu1 %v194_v23  ;;  %p668_p10 = pnand %p667_p9, %p661_p6 }
  0x48   :  { %490 = vmatprep.subr.mxu0 %v88_v20  ;;  %522 = vmatpush3.msra.mxu1 %v194_v23 }
  0x49   :  { %491 = vmatpush3.msra.mxu0 %v88_v20  ;;  %523 = vmatprep.subr.mxu1 %v193_v25 }
  0x4a   :  { %492 = vmatprep.subr.mxu0 %v87_v22  ;;  %524 = vmatpush3.msra.mxu1 %v193_v25 }
  0x4b   :  { %493 = vmatpush3.msra.mxu0 %v87_v22  ;;  %525 = vmatprep.subr.mxu1 %v192_v27 }
  0x4c   :  { %494 = vmatprep.subr.mxu0 %v86_v24  ;;  %526 = vmatpush3.msra.mxu1 %v192_v27 }
  0x4d   :  { %495 = vmatpush3.msra.mxu0 %v86_v24  ;;  %527 = vmatprep.subr.mxu1 %v191_v30 }
  0x4e   :  { %496 = vmatprep.subr.mxu0 %v85_v26  ;;  %528 = vmatpush3.msra.mxu1 %v191_v30 }
  0x4f   :  { %497 = vmatpush3.msra.mxu0 %v85_v26  ;;  %529 = vmatprep.subr.mxu1 %v190_v31 }
  0x50   :  { %498 = vmatprep.subr.mxu0 %v84_v28  ;;  %530 = vmatpush3.msra.mxu1 %v190_v31 }
  0x51   :  { %499 = vmatpush3.msra.mxu0 %v84_v28  ;;  %531 = vmatprep.subr.mxu1 %v189_v32 }
  0x52   :  { %501 = vmatmul.mubr.f32.vlgmr.msra.gmra.mxu0 %v83_v29  ;;  %532 = vmatpush3.msra.mxu1 %v189_v32 }
  0x53   :  { %533 = vmatprep.subr.mxu1 %v188_v33  ;;  %538 = vmatprep.subr.mxu0 %v307_v34 }
  0x54   :  { %534 = vmatpush3.msra.mxu1 %v188_v33  ;;  %539 = vmatpush3.msra.mxu0 %v307_v34 }
  0x55   :  { %540 = vmatprep.subr.mxu0 %v306_v35 }
  0x56   :  { %541 = vmatpush3.msra.mxu0 %v306_v35 }
  0x57   :  { %542 = vmatprep.subr.mxu0 %v305_v36 }
  0x58   :  { %543 = vmatpush3.msra.mxu0 %v305_v36 }
  0x59   :  { %544 = vmatprep.subr.mxu0 %v304_v37 }
  0x5a   :  { %545 = vmatpush3.msra.mxu0 %v304_v37 }
  0x5b   :  { %546 = vmatprep.subr.mxu0 %v303_v38 }
  0x5c   :  { %547 = vmatpush3.msra.mxu0 %v303_v38 }
  0x5d   :  { %548 = vmatprep.subr.mxu0 %v302_v39 }
  0x5e   :  { %549 = vmatpush3.msra.mxu0 %v302_v39 }
  0x5f   :  { %550 = vmatprep.subr.mxu0 %v301_v40 }
  0x60   :  { %551 = vmatpush3.msra.mxu0 %v301_v40 }
  0x61   :  { %552 = vmatprep.subr.mxu0 %v300_v41 }
  0x62   :  { %553 = vmatpush3.msra.mxu0 %v300_v41 }
  0x63   :  { %554 = vmatprep.subr.mxu0 %v299_v42 }
  0x64   :  { %555 = vmatpush3.msra.mxu0 %v299_v42 }
  0x65   :  { %556 = vmatprep.subr.mxu0 %v298_v43 }
  0x66   :  { %557 = vmatpush3.msra.mxu0 %v298_v43 }
  0x67   :  { %558 = vmatprep.subr.mxu0 %v297_v44 }
  0x68   :  { %559 = vmatpush3.msra.mxu0 %v297_v44 }
  0x69   :  { %560 = vmatprep.subr.mxu0 %v296_v45 }
  0x6a   :  { %561 = vmatpush3.msra.mxu0 %v296_v45 }
  0x6b   :  { %562 = vmatprep.subr.mxu0 %v295_v55 }
  0x6c   :  { %563 = vmatpush3.msra.mxu0 %v295_v55 }
  0x6d   :  { %564 = vmatprep.subr.mxu0 %v294_v56 }
  0x6e   :  { %565 = vmatpush3.msra.mxu0 %v294_v56 }
  0x6f   :  { %566 = vmatprep.subr.mxu0 %v293_v57 }
  0x70   :  { %567 = vmatpush3.msra.mxu0 %v293_v57 }
  0x71   :  { %568 = vmatprep.subr.mxu0 %v292_v58 }
  0x72   :  { %569 = vmatpush3.msra.mxu0 %v292_v58 }
 0x112   :  { %v502_v47 = vpop.f32.mrf.mxu0 }
 0x113   :  { %v179_v48 = vadd.f32 %v502_v47, %v411_v46 }
 0x114   :  { %v173_v49 = vpop.f32.mrf.mxu0 }
 0x115   :  { %v174_v50 = vadd.f32 %v411_v46, %v173_v49  ;;  %v185_v51 = vmul.f32 0.01, %v179_v48  ;;  %vm183_vm1 = vcmp.gt.f32.partialorder %v179_v48, 0.0 }
 0x117   :  { %vm182_vm0 = vcmp.gt.f32.partialorder %v174_v50, 0.0  ;;  %v184_v52 = vmul.f32 0.01, %v174_v50  ;;  %v187_v54 = vsel %vm183_vm1, %v179_v48, %v185_v51 }
 0x119   :  { %v186_v53 = vsel %vm182_vm0, %v174_v50, %v184_v52 }
 0x11a   :  { %535 = vmatprep.mubr.f32.mxu1 %v186_v53 }
 0x11b   :  { %536 = vmatmul.mubr.f32.vlgmr.msra.gmra.mxu1 %v187_v54 }
 0x1db   :  { %v537_v60 = vpop.f32.mrf.mxu1 }
 0x1dc   :  { %v283_v61 = vadd.f32 %v537_v60, %v412_v59 }
 0x1dd   :  { %v277_v62 = vpop.f32.mrf.mxu1 }
 0x1de   :  { %v278_v63 = vadd.f32 %v412_v59, %v277_v62  ;;  %v289_v0 = vmul.f32 0.01, %v283_v61  ;;  %vm287_vm2 = vcmp.gt.f32.partialorder %v283_v61, 0.0 }
 0x1e0   :  { %v288_v1 = vmul.f32 0.01, %v278_v63  ;;  %vm286_vm3 = vcmp.gt.f32.partialorder %v278_v63, 0.0  ;;  %v291_v3 = vsel %vm287_vm2, %v283_v61, %v289_v0 }
 0x1e2   :  { %v290_v2 = vsel %vm286_vm3, %v278_v63, %v288_v1 }
 0x1e3   :  { %570 = vmatprep.mubr.f32.mxu0 %v290_v2 }
 0x1e4   :  { %571 = vmatmul.mubr.f32.vlgmr.msra.gmra.mxu0 %v291_v3 }
 0x2a4   :  { %v572_v5 = vpop.f32.mrf.mxu0 }
 0x2a5   :  { %v387_v6 = vadd.f32 %v572_v5, %v413_v4 }
 0x2a6   :  { %v381_v7 = vpop.f32.mrf.mxu0 }
 0x2a7   :  { %391 = vst [vmem:[#allocation10 + $0x8] sm:$0xff] %v387_v6  ;;  %v382_v8 = vadd.f32 %v413_v4, %v381_v7 }
 0x2a9   :  { %390 = vst [vmem:[#allocation10] sm:$0xff] %v382_v8 }
 0x2aa   :  { %671 = shalt.err (!%p668_p10)
}
 0x2ab   :  { %403 = dma.vmem_to_hbm [thread:$0]  %s398_s25, 256, %s781_s7, [#allocation4], %s690_s29, %s690_s29, %s691_s30  }
 0x2ac   :  { %686 = dma.done.wait [#allocation4], 256  }
 0x2ad   :  { %687 = vsyncadd [#allocation4], 4294967040 }
 0x2ae   :  { %407 = vsyncpa [#allocation3], 1 }
 0x2af   :  { %408 = vsyncpa [#allocation6], 1 }
 0x2b0   :  { %409 = vsyncpa [#allocation9], 1 }
 0x2b1   :  { %410 = vsyncpa [#allocation4], 1 }

</bundles_post_ra>
